<compile_context>
chip_gen: v6e
topology: v6e:2x2x1
jax: 0.10.0
libtpu: 0.0.40
codegen_flags: <defaults>
</compile_context>

<pallas_src>
import functools

import jax
import jax.numpy as jnp
from jax import lax
from jax.experimental import pallas as pl
from jax.experimental.pallas import tpu as pltpu

_LANE = 128
_EPS = 1e-5


def _basemodel_kernel(x_ref, p_ref, b_ref, y_ref, pred_ref, loss_ref,
                      acc_ref, c_ref, *, loss_sum, inv_batch):
    """One (B, tf) feature tile of fused BN(train) + Linear(F,1) + ReLU + MSE."""
    j = pl.program_id(0)

    @pl.when(j == 0)
    def _init():
        acc_ref[...] = jnp.zeros_like(acc_ref)
        c_ref[...] = jnp.zeros_like(c_ref)

    x = x_ref[...].astype(jnp.float32)         # (B, tf); cast rides idle VALU slots
    gamma = p_ref[0:1, :]                      # (1, tf)
    beta = p_ref[1:2, :]                       # (1, tf)
    w = p_ref[2:3, :]                          # (1, tf)

    # ---- BatchNorm1d stats (training mode, biased variance), two-pass form ----
    mean = jnp.mean(x, axis=0, keepdims=True)            # (1, tf)  sublane reduce
    xm = x - mean
    var = jnp.mean(xm * xm, axis=0, keepdims=True)       # (1, tf)
    inv_std = lax.rsqrt(var + _EPS)                       # EUP

    # ---- Fused BN-affine + Linear(F -> 1): never materialize xbn ----
    a = gamma * inv_std * w                                        # (1, tf)
    acc_ref[...] += jnp.sum(x * a, axis=1, keepdims=True)          # (B, 1) partial logits
    c_ref[...] += jnp.sum(w * beta - mean * a, axis=1, keepdims=True)  # (1, 1) partial const

    # ---- Dropout(p=0.0) is the identity; p > 0 rejected in the wrapper ----

    @pl.when(j == pl.num_programs(0) - 1)
    def _finalize():
        logits = acc_ref[...] + c_ref[...] + b_ref[0]              # (B, 1)
        pred = jnp.maximum(logits, 0.0)
        pred_ref[...] = pred
        diff = pred - y_ref[...]                                   # (B, 1)
        se = jnp.sum(diff * diff, axis=0, keepdims=True)[0, 0]
        loss_ref[0] = se if loss_sum else se * inv_batch


def basemodel_forward(x, gamma, beta, w, b, y, *, loss_sum=0, dropout_p=0.0):
    """x:(B,F) gamma/beta/w:(F,) b:scalar y:(B,) -> (prediction:(B,), loss:())."""
    if dropout_p > 0.0:
        # TODO(synk): stochastic dropout mask (pltpu.prng_seed/prng_random_bits)
        #             not implemented; only p == 0.0 (identity) is supported.
        raise NotImplementedError("only dropout_p == 0.0 is supported")

    B, F = x.shape
    f_pad = max(_LANE, ((F + _LANE - 1) // _LANE) * _LANE)
    tf = next(t for t in (512, 256, 128) if f_pad % t == 0)   # lane-dense feature tile
    grid = (f_pad // tf,)

    params = jnp.stack([gamma, beta, w], axis=0).astype(jnp.float32)   # (3, F) lane-dense
    if f_pad != F:
        # Zero-padded features have gamma=beta=w=0 -> contribute exactly 0.
        x = jnp.pad(x, ((0, 0), (0, f_pad - F)))
        params = jnp.pad(params, ((0, 0), (0, f_pad - F)))

    b1 = jnp.reshape(b, (1,)).astype(jnp.float32)        # scalar bias in SMEM
    y_col = y.reshape(B, 1).astype(jnp.float32)          # (B, 1)

    kernel = functools.partial(
        _basemodel_kernel,
        loss_sum=bool(loss_sum),
        inv_batch=1.0 / B,
    )

    cost = pl.CostEstimate(
        flops=int(7 * B * f_pad),
        transcendentals=int(f_pad),
        bytes_accessed=int(x.size * x.dtype.itemsize + params.size * 4
                           + (2 * B + 3) * 4),
    )

    pred_col, loss = pl.pallas_call(
        kernel,
        out_shape=(
            jax.ShapeDtypeStruct((B, 1), jnp.float32),   # prediction column
            jax.ShapeDtypeStruct((1,), jnp.float32),     # loss scalar
        ),
        grid_spec=pltpu.PrefetchScalarGridSpec(
            num_scalar_prefetch=0,
            grid=grid,
            in_specs=[
                pl.BlockSpec((B, tf), lambda j: (0, j)),             # x, native (B,F)
                pl.BlockSpec((3, tf), lambda j: (0, j)),             # [gamma; beta; w]
                pl.BlockSpec(memory_space=pltpu.MemorySpace.SMEM),   # bias (1,)
                pl.BlockSpec((B, 1), lambda j: (0, 0)),              # y (B,1), resident
            ],
            out_specs=(
                pl.BlockSpec((B, 1), lambda j: (0, 0)),              # pred (B,1)
                pl.BlockSpec(memory_space=pltpu.MemorySpace.SMEM),   # loss (1,)
            ),
            scratch_shapes=[
                pltpu.VMEM((B, 1), jnp.float32),    # logit accumulator
                pltpu.VMEM((1, 1), jnp.float32),    # constant-term accumulator
            ],
        ),
        compiler_params=pltpu.CompilerParams(
            dimension_semantics=("arbitrary",),     # feature axis is a reduction
        ),
        cost_estimate=cost,
    )(x, params, b1, y_col)

    return pred_col.reshape(-1), loss.reshape(())


def _reference(x, gamma, beta, w, b, y, loss_sum=0):
    xf = x.astype(jnp.float32)
    mean = jnp.mean(xf, axis=0, keepdims=True)
    var = jnp.mean((xf - mean) ** 2, axis=0, keepdims=True)   # biased, like BN training
    xhat = (xf - mean) / jnp.sqrt(var + _EPS)
    xbn = xhat * gamma[None, :] + beta[None, :]
    pred = jnp.maximum(xbn @ w.reshape(-1, 1) + b, 0.0).reshape(-1)
    diff = pred - y
    loss = jnp.sum(diff * diff) if loss_sum else jnp.mean(diff * diff)
    return pred, loss


if __name__ == "__main__":
    key = jax.random.PRNGKey(0)
    B, F = 8, 256          # small batch; F spans 2 feature tiles -> exercises accumulation

    k_x, k_y, k_w, k_b, k_g, k_be = jax.random.split(key, 6)
    x = jax.random.normal(k_x, (B, F), dtype=jnp.float32)
    y = jax.random.uniform(k_y, (B,), dtype=jnp.float32)        # labels in [0, 1)

    # BatchNorm1d default init is gamma=1, beta=0; perturb so the affine path is exercised.
    gamma = 1.0 + 0.1 * jax.random.normal(k_g, (F,), dtype=jnp.float32)
    beta = 0.1 * jax.random.normal(k_be, (F,), dtype=jnp.float32)
    # Linear init per BaseModel.init_paras: normal(mean=0, std=0.01).
    w = 0.01 * jax.random.normal(k_w, (F,), dtype=jnp.float32)
    b = 0.01 * jax.random.normal(k_b, (), dtype=jnp.float32)

    pred, loss = basemodel_forward(x, gamma, beta, w, b, y, loss_sum=0)
    pred_s, loss_s = basemodel_forward(x, gamma, beta, w, b, y, loss_sum=1)
    jax.block_until_ready((pred, loss, pred_s, loss_s))

    ref_pred, ref_loss = _reference(x, gamma, beta, w, b, y, loss_sum=0)
    _, ref_loss_sum = _reference(x, gamma, beta, w, b, y, loss_sum=1)

    assert jnp.allclose(pred, ref_pred, atol=1e-5, rtol=1e-4)
    assert jnp.allclose(loss, ref_loss, atol=1e-5, rtol=1e-4)
    assert jnp.allclose(pred_s, ref_pred, atol=1e-5, rtol=1e-4)
    assert jnp.allclose(loss_s, ref_loss_sum, atol=1e-5, rtol=1e-4)

    # Non-multiple-of-128 feature count exercises the zero-padding path.
    F2 = 200
    x2 = jax.random.normal(jax.random.PRNGKey(1), (B, F2), dtype=jnp.float32)
    g2 = 1.0 + 0.05 * jax.random.normal(jax.random.PRNGKey(3), (F2,), dtype=jnp.float32)
    be2 = 0.05 * jax.random.normal(jax.random.PRNGKey(4), (F2,), dtype=jnp.float32)
    w2 = 0.01 * jax.random.normal(jax.random.PRNGKey(2), (F2,), dtype=jnp.float32)
    pred2, loss2 = basemodel_forward(x2, g2, be2, w2, b, y, loss_sum=0)
    jax.block_until_ready((pred2, loss2))
    ref2_pred, ref2_loss = _reference(x2, g2, be2, w2, b, y, loss_sum=0)
    assert jnp.allclose(pred2, ref2_pred, atol=1e-5, rtol=1e-4)
    assert jnp.allclose(loss2, ref2_loss, atol=1e-5, rtol=1e-4)

    print("KERNEL_OK")
</pallas_src>

<mosaic_0001>
module attributes {stable_mosaic.version = 11 : i64} {
  func.func @_basemodel_kernel(%arg0: i32, %arg1: memref<8x256xf32, #tpu.memory_space<vmem>>, %arg2: memref<3x256xf32, #tpu.memory_space<vmem>>, %arg3: memref<1xf32, #tpu.memory_space<smem>>, %arg4: memref<8x1xf32, #tpu.memory_space<vmem>>, %arg5: memref<8x1xf32, #tpu.memory_space<vmem>>, %arg6: memref<1xf32, #tpu.memory_space<smem>>, %arg7: memref<8x1xf32, #tpu.memory_space<vmem>>, %arg8: memref<1x1xf32, #tpu.memory_space<vmem>>) attributes {dimension_semantics = [#tpu.dimension_semantics<arbitrary>], iteration_bounds = array<i64: 1>, scalar_prefetch = 0 : i64, scratch_operands = 2 : i64, tpu.core_type = #tpu.core_type<tc>, window_params = [{transform_indices = @transform_0, window_bounds = array<i64: 8, 256>}, {transform_indices = @transform_1, window_bounds = array<i64: 3, 256>}, {transform_indices = @transform_2, window_bounds = array<i64: 1>}, {pipeline_mode = #tpu.pipeline_mode<synchronous>, transform_indices = @transform_3, window_bounds = array<i64: 8, 1>}, {pipeline_mode = #tpu.pipeline_mode<synchronous>, transform_indices = @transform_4, window_bounds = array<i64: 8, 1>}, {transform_indices = @transform_5, window_bounds = array<i64: 1>}]} {
    %c0_i32 = arith.constant 0 : i32
    %0 = arith.cmpi eq, %arg0, %c0_i32 : i32
    %1 = arith.extui %0 : i1 to i32
    %c0_i32_0 = arith.constant 0 : i32
    %2 = arith.cmpi ne, %1, %c0_i32_0 : i32
    scf.if %2 {
      %cst_22 = arith.constant 0.000000e+00 : f32
      %41 = vector.broadcast %cst_22 : f32 to vector<8x1xf32>
      %c0_23 = arith.constant 0 : index
      %c0_24 = arith.constant 0 : index
      %42 = vector.load %arg7[%c0_23, %c0_24] : memref<8x1xf32, #tpu.memory_space<vmem>>, vector<8x1xf32>
      tpu.vector_store %arg7[%c0_23, %c0_24], %41 {strides = array<i32>} : memref<8x1xf32, #tpu.memory_space<vmem>>, vector<8x1xf32>,
      %cst_25 = arith.constant 0.000000e+00 : f32
      %43 = vector.broadcast %cst_25 : f32 to vector<1x1xf32>
      %c0_26 = arith.constant 0 : index
      %c0_27 = arith.constant 0 : index
      %44 = vector.load %arg8[%c0_26, %c0_27] : memref<1x1xf32, #tpu.memory_space<vmem>>, vector<1x1xf32>
      tpu.vector_store %arg8[%c0_26, %c0_27], %43 {strides = array<i32>} : memref<1x1xf32, #tpu.memory_space<vmem>>, vector<1x1xf32>,
    } else {
    }
    %c0 = arith.constant 0 : index
    %c0_1 = arith.constant 0 : index
    %3 = vector.load %arg1[%c0, %c0_1] : memref<8x256xf32, #tpu.memory_space<vmem>>, vector<8x256xf32>
    %c0_2 = arith.constant 0 : index
    %c0_3 = arith.constant 0 : index
    %4 = vector.load %arg2[%c0_2, %c0_3] : memref<3x256xf32, #tpu.memory_space<vmem>>, vector<1x256xf32>
    %c1 = arith.constant 1 : index
    %c0_4 = arith.constant 0 : index
    %5 = vector.load %arg2[%c1, %c0_4] : memref<3x256xf32, #tpu.memory_space<vmem>>, vector<1x256xf32>
    %c2 = arith.constant 2 : index
    %c0_5 = arith.constant 0 : index
    %6 = vector.load %arg2[%c2, %c0_5] : memref<3x256xf32, #tpu.memory_space<vmem>>, vector<1x256xf32>
    %cst = arith.constant dense<0.000000e+00> : vector<256xf32>
    %7 = vector.multi_reduction <add>, %3, %cst [0] : vector<8x256xf32> to vector<256xf32>
    %8 = vector.shape_cast %7 : vector<256xf32> to vector<1x256xf32>
    %cst_6 = arith.constant 8.000000e+00 : f32
    %9 = vector.broadcast %cst_6 : f32 to vector<1x256xf32>
    %10 = arith.divf %8, %9 : vector<1x256xf32>
    %11 = vector.broadcast %10 : vector<1x256xf32> to vector<8x256xf32>
    %12 = arith.subf %3, %11 : vector<8x256xf32>
    %13 = arith.mulf %12, %12 : vector<8x256xf32>
    %cst_7 = arith.constant dense<0.000000e+00> : vector<256xf32>
    %14 = vector.multi_reduction <add>, %13, %cst_7 [0] : vector<8x256xf32> to vector<256xf32>
    %15 = vector.shape_cast %14 : vector<256xf32> to vector<1x256xf32>
    %cst_8 = arith.constant 8.000000e+00 : f32
    %16 = vector.broadcast %cst_8 : f32 to vector<1x256xf32>
    %17 = arith.divf %15, %16 : vector<1x256xf32>
    %cst_9 = arith.constant 9.99999974E-6 : f32
    %18 = vector.broadcast %cst_9 : f32 to vector<1x256xf32>
    %19 = arith.addf %17, %18 : vector<1x256xf32>
    %20 = math.rsqrt %19 : vector<1x256xf32>
    %21 = arith.mulf %4, %20 : vector<1x256xf32>
    %22 = arith.mulf %21, %6 : vector<1x256xf32>
    %c0_10 = arith.constant 0 : index
    %c0_11 = arith.constant 0 : index
    %23 = vector.load %arg7[%c0_10, %c0_11] : memref<8x1xf32, #tpu.memory_space<vmem>>, vector<8x1xf32>
    %24 = vector.broadcast %22 : vector<1x256xf32> to vector<8x256xf32>
    %25 = arith.mulf %3, %24 : vector<8x256xf32>
    %cst_12 = arith.constant dense<0.000000e+00> : vector<8xf32>
    %26 = vector.multi_reduction <add>, %25, %cst_12 [1] : vector<8x256xf32> to vector<8xf32>
    %27 = vector.shape_cast %26 : vector<8xf32> to vector<8x1xf32>
    %28 = arith.addf %23, %27 : vector<8x1xf32>
    %c0_13 = arith.constant 0 : index
    %c0_14 = arith.constant 0 : index
    %29 = vector.load %arg7[%c0_13, %c0_14] : memref<8x1xf32, #tpu.memory_space<vmem>>, vector<8x1xf32>
    tpu.vector_store %arg7[%c0_13, %c0_14], %28 {strides = array<i32>} : memref<8x1xf32, #tpu.memory_space<vmem>>, vector<8x1xf32>,
    %c0_15 = arith.constant 0 : index
    %c0_16 = arith.constant 0 : index
    %30 = vector.load %arg8[%c0_15, %c0_16] : memref<1x1xf32, #tpu.memory_space<vmem>>, vector<1x1xf32>
    %31 = arith.mulf %6, %5 : vector<1x256xf32>
    %32 = arith.mulf %10, %22 : vector<1x256xf32>
    %33 = arith.subf %31, %32 : vector<1x256xf32>
    %cst_17 = arith.constant dense<0.000000e+00> : vector<1xf32>
    %34 = vector.multi_reduction <add>, %33, %cst_17 [1] : vector<1x256xf32> to vector<1xf32>
    %35 = vector.shape_cast %34 : vector<1xf32> to vector<1x1xf32>
    %36 = arith.addf %30, %35 : vector<1x1xf32>
    %c0_18 = arith.constant 0 : index
    %c0_19 = arith.constant 0 : index
    %37 = vector.load %arg8[%c0_18, %c0_19] : memref<1x1xf32, #tpu.memory_space<vmem>>, vector<1x1xf32>
    tpu.vector_store %arg8[%c0_18, %c0_19], %36 {strides = array<i32>} : memref<1x1xf32, #tpu.memory_space<vmem>>, vector<1x1xf32>,
    %c0_i32_20 = arith.constant 0 : i32
    %38 = arith.cmpi eq, %arg0, %c0_i32_20 : i32
    %39 = arith.extui %38 : i1 to i32
    %c0_i32_21 = arith.constant 0 : i32
    %40 = arith.cmpi ne, %39, %c0_i32_21 : i32
    scf.if %40 {
      %c0_22 = arith.constant 0 : index
      %c0_23 = arith.constant 0 : index
      %41 = vector.load %arg7[%c0_22, %c0_23] : memref<8x1xf32, #tpu.memory_space<vmem>>, vector<8x1xf32>
      %c0_24 = arith.constant 0 : index
      %c0_25 = arith.constant 0 : index
      %42 = vector.load %arg8[%c0_24, %c0_25] : memref<1x1xf32, #tpu.memory_space<vmem>>, vector<1x1xf32>
      %43 = vector.broadcast %42 : vector<1x1xf32> to vector<8x1xf32>
      %44 = arith.addf %41, %43 : vector<8x1xf32>
      %c0_26 = arith.constant 0 : index
      %45 = memref.load %arg3[%c0_26] : memref<1xf32, #tpu.memory_space<smem>>
      %46 = vector.broadcast %45 : f32 to vector<8x1xf32>
      %47 = arith.addf %44, %46 : vector<8x1xf32>
      %cst_27 = arith.constant 0.000000e+00 : f32
      %48 = vector.broadcast %cst_27 : f32 to vector<8x1xf32>
      %49 = arith.maximumf %47, %48 : vector<8x1xf32>
      %c0_28 = arith.constant 0 : index
      %c0_29 = arith.constant 0 : index
      %50 = vector.load %arg5[%c0_28, %c0_29] : memref<8x1xf32, #tpu.memory_space<vmem>>, vector<8x1xf32>
      tpu.vector_store %arg5[%c0_28, %c0_29], %49 {strides = array<i32>} : memref<8x1xf32, #tpu.memory_space<vmem>>, vector<8x1xf32>,
      %c0_30 = arith.constant 0 : index
      %c0_31 = arith.constant 0 : index
      %51 = vector.load %arg4[%c0_30, %c0_31] : memref<8x1xf32, #tpu.memory_space<vmem>>, vector<8x1xf32>
      %52 = arith.subf %49, %51 : vector<8x1xf32>
      %53 = arith.mulf %52, %52 : vector<8x1xf32>
      %cst_32 = arith.constant dense<0.000000e+00> : vector<1xf32>
      %54 = vector.multi_reduction <add>, %53, %cst_32 [0] : vector<8x1xf32> to vector<1xf32>
      %55 = vector.shape_cast %54 : vector<1xf32> to vector<1x1xf32>
      %56 = vector.extract %55[0, 0] : f32 from vector<1x1xf32>
      %cst_33 = arith.constant 1.250000e-01 : f32
      %57 = arith.mulf %56, %cst_33 : f32
      %c0_34 = arith.constant 0 : index
      %58 = memref.load %arg6[%c0_34] : memref<1xf32, #tpu.memory_space<smem>>
      memref.store %57, %arg6[%c0_34] : memref<1xf32, #tpu.memory_space<smem>>
    } else {
    }
    return
  }
  func.func @transform_0(%arg0: i32) -> (i32, i32) {
    %c0_i32 = arith.constant 0 : i32
    %c0_i32_0 = arith.constant 0 : i32
    return %c0_i32, %arg0 : i32, i32
  }
  func.func @transform_1(%arg0: i32) -> (i32, i32) {
    %c0_i32 = arith.constant 0 : i32
    %c0_i32_0 = arith.constant 0 : i32
    return %c0_i32, %arg0 : i32, i32
  }
  func.func @transform_2(%arg0: i32) -> i32 {
    %c0_i32 = arith.constant 0 : i32
    %c0_i32_0 = arith.constant 0 : i32
    return %c0_i32 : i32
  }
  func.func @transform_3(%arg0: i32) -> (i32, i32) {
    %c0_i32 = arith.constant 0 : i32
    %c0_i32_0 = arith.constant 0 : i32
    %c0_i32_1 = arith.constant 0 : i32
    return %c0_i32, %c0_i32_0 : i32, i32
  }
  func.func @transform_4(%arg0: i32) -> (i32, i32) {
    %c0_i32 = arith.constant 0 : i32
    %c0_i32_0 = arith.constant 0 : i32
    %c0_i32_1 = arith.constant 0 : i32
    return %c0_i32, %c0_i32_0 : i32, i32
  }
  func.func @transform_5(%arg0: i32) -> i32 {
    %c0_i32 = arith.constant 0 : i32
    %c0_i32_0 = arith.constant 0 : i32
    return %c0_i32 : i32
  }
}

</mosaic_0001>

<bundles_post_ra>
// kernel: tpu_custom_call.1
= control target key start
LH: loop header
LB: loop body
LE: loop exit
PB: predicated region body
PF: predicated region fallthrough
CT: control target
= control target key end

     0   :  { %12 = vsyncpa [#allocation6], 0  ;;  %s326_s0 = inlined_call_operand.hbm [shape: f32[8,256], index: 0, kind: input, shape index: {}]   ;;  %s327_s1 = inlined_call_operand.vmem [shape: f32[3,256], index: 1, kind: input, shape index: {}]   ;;  %s328_s2 = inlined_call_operand.<no memory space> [shape: f32[1], index: 2, kind: input, shape index: {}]   ;;  %s329_s3 = inlined_call_operand.vmem [shape: f32[8,1], index: 3, kind: input, shape index: {}]   ;;  %s330_s4 = inlined_call_operand.vmem [shape: f32[8,1], index: 4, kind: output, shape index: {0}]   ;;  %s331_s5 = inlined_call_operand.hbm [shape: f32[1], index: 5, kind: output, shape index: {1}]  }
   0x1   :  { %13 = vsyncpa [#allocation7], 0  ;;  %s262_s18 = smov [#allocation5]  }
   0x2   :  { %s20_s19 = sshll.u32 %s262_s18, 4  ;;  %s21_s19 = int_to_ptr.vmem [resolvable:$true] %s20_s19 }
   0x3   :  { %s238_s20 = scalar_lea.vmem %s21_s19, 256  ;;  %p243_p1 = scmp.lt.s32.totalorder %s21_s19, %s21_s19 }
   0x4   :  { %p239_p0 = scmp.ne.s32.totalorder %s21_s19, %s238_s20  ;;  %p244_p2 = scmp.lt.s32.totalorder %s238_s20, %s238_s20 }
   0x6   :  { %p245_p3 = por %p244_p2, %p243_p1 }
   0x8   :  { %p246_p4 = pnand %p245_p3, %p239_p0 }
   0xa   :  { %249 = shalt.err (!%p246_p4)
}
   0xb   :  { %23 = dma.hbm_to_vmem [thread:$0]  %s326_s0, 256, %s21_s19, [#allocation6]  }
   0xc   :  { %258 = dma.done.wait [#allocation6], 256  }
   0xd   :  { %259 = vsyncadd [#allocation6], 4294967040  ;;  %vm37_vm0 = vcmask 7168   ;;  %v263_v0 = vmov 0.0   ;;  %v41_v1 = vld [vmem:[#allocation5] sm:$0xff]  ;;  %v42_v2 = vld [vmem:[#allocation5 + $0x8] sm:$0xff]  ;;  %v91_v39 = vlaneseq }
   0xe   :  { %38 = vst.msk [vmem:[#allocation2] sm:$0xff] %vm37_vm0, %v263_v0  ;;  %v48_v3 = vrot.slane %v41_v1, 4  ;;  %v54_v4 = vrot.slane %v42_v2, 4  ;;  %v264_v37 = vmov 1966171168   ;;  %vm159_vm1 = vcmask 1040384  }
   0xf   :  { %v89_v38 = vunpack.c.l.s4 %v264_v37  ;;  %v92_v41 = vshrl.u32 %v91_v39, 7  ;;  %v43_v47 = vld [vmem:[%s327_s1] ss:$4 sm:$0x3]  ;;  %vm39_vm2 = vcmask 0  }
  0x10   :  { %v49_v5 = vadd.f32 %v48_v3, %v41_v1  ;;  %v55_v6 = vadd.f32 %v54_v4, %v42_v2  ;;  %v218_v49 = vld [vmem:[%s327_s1 + $0x2] ss:$4 sm:$0x3]  ;;  %v217_v60 = vld [vmem:[%s327_s1 + $0x1] ss:$4 sm:$0x3] }
  0x11   :  { %v90_v40 = vunpack.c.0.s8 %v89_v38  ;;  %v109_v51 = vsub.s32 0, %v92_v41  ;;  %v113_v52 = vsub.s32 1, %v92_v41  ;;  %v126_v63 = vmul.f32 %v218_v49, %v217_v60  ;;  %40 = vst.msk [vmem:[#allocation3] sm:$0x1] %vm39_vm2, %v263_v0  ;;  %v185_v0 = vld [vmem:[%s329_s3] sm:$0xff]  ;;  %s265_s3 = smov [#allocation8]  }
  0x12   :  { %v50_v7 = vrot.slane %v49_v5, 2  ;;  %v56_v8 = vrot.slane %v55_v6, 2 }
  0x13   :  { %v93_v43 = vsub.s32 %v90_v40, %v92_v41 }
  0x14   :  { %v51_v9 = vadd.f32 %v50_v7, %v49_v5  ;;  %v57_v10 = vadd.f32 %v56_v8, %v55_v6 }
  0x16   :  { %v52_v11 = vrot.slane %v51_v9, 1  ;;  %v58_v12 = vrot.slane %v57_v10, 1 }
  0x18   :  { %v53_v13 = vadd.f32 %v52_v11, %v51_v9  ;;  %v59_v14 = vadd.f32 %v58_v12, %v57_v10  ;;  %v125_v12 = vld [vmem:[#allocation3] sm:$0x1] }
  0x1a   :  { %v61_v15 = vmul.f32 0.125, %v53_v13  ;;  %v62_v16 = vmul.f32 0.125, %v59_v14 }
  0x1c   :  { %v63_v17 = vsub.f32 %v41_v1, %v61_v15  ;;  %v64_v18 = vsub.f32 %v42_v2, %v62_v16 }
  0x1e   :  { %v65_v19 = vmul.f32 %v63_v17, %v63_v17  ;;  %v66_v20 = vmul.f32 %v64_v18, %v64_v18  ;;  %v181_v17 = vstv %s328_s2 }
  0x20   :  { %v67_v21 = vrot.slane %v65_v19, 4  ;;  %v73_v22 = vrot.slane %v66_v20, 4 }
  0x22   :  { %v68_v23 = vadd.f32 %v67_v21, %v65_v19  ;;  %v74_v24 = vadd.f32 %v73_v22, %v66_v20 }
  0x24   :  { %v69_v25 = vrot.slane %v68_v23, 2  ;;  %v75_v26 = vrot.slane %v74_v24, 2 }
  0x26   :  { %v70_v27 = vadd.f32 %v69_v25, %v68_v23  ;;  %v76_v28 = vadd.f32 %v75_v26, %v74_v24 }
  0x28   :  { %v71_v29 = vrot.slane %v70_v27, 1  ;;  %v77_v30 = vrot.slane %v76_v28, 1 }
  0x2a   :  { %v72_v31 = vadd.f32 %v71_v29, %v70_v27  ;;  %v78_v32 = vadd.f32 %v77_v30, %v76_v28 }
  0x2c   :  { %v79_v33 = vmul.f32 0.125, %v72_v31  ;;  %v80_v34 = vmul.f32 0.125, %v78_v32 }
  0x2e   :  { %v81_v35 = vadd.f32 1e-05, %v79_v33  ;;  %v82_v36 = vadd.f32 1e-05, %v80_v34 }
  0x30   :  { %226 = vrsqrt.f32 %v81_v35 }
  0x31   :  { %228 = vrsqrt.f32 %v82_v36 }
  0x3d   :  { %v227_v42 = vpop.eup %226 }
  0x3e   :  { %v229_v44 = vpop.eup %228 }
  0x3f   :  { %v87_v45 = vcombine.low %v227_v42, %v229_v44 }
  0x41   :  { %v94_v46 = vrot.slane %v87_v45, %v93_v43 }
  0x43   :  { %v101_v48 = vrot.slane %v94_v46, %v93_v43 }
  0x45   :  { %v103_v50 = vmul.f32 %v101_v48, %v43_v47 }
  0x47   :  { %v104_v53 = vmul.f32 %v218_v49, %v103_v50 }
  0x49   :  { %v110_v54 = vrot.slane %v104_v53, %v109_v51  ;;  %v114_v55 = vrot.slane %v104_v53, %v113_v52 }
  0x4b   :  { %v117_v56 = vmul.f32 %v110_v54, %v41_v1  ;;  %v118_v57 = vmul.f32 %v114_v55, %v42_v2  ;;  %v127_v58 = vmul.f32 %v110_v54, %v61_v15  ;;  %v128_v59 = vmul.f32 %v114_v55, %v62_v16  ;;  %v105_v2 = vld [vmem:[#allocation2] sm:$0xff] }
  0x4d   :  { %v119_v61 = vadd.f32 %v118_v57, %v117_v56  ;;  %v131_v62 = vcombine.low %v127_v58, %v128_v59 }
  0x4f   :  { %v138_v3 = vrot.slane %v131_v62, %v93_v43  ;;  %120 = vadd.xlane.f32.xlu0 %v119_v61 }
  0x51   :  { %v145_v4 = vrot.slane %v138_v3, %v93_v43 }
  0x53   :  { %v147_v5 = vsub.f32 %v126_v63, %v145_v4 }
  0x55   :  { %v152_v6 = vrot.slane %v147_v5, %v109_v51  ;;  %v156_v7 = vrot.slane %v147_v5, %v113_v52 }
  0x57   :  { %v160_v8 = vsel %vm159_vm1, %v152_v6, 0.0  ;;  %v161_v9 = vsel %vm159_vm1, %v156_v7, 0.0 }
  0x58   :  { %v162_v1 = vadd.f32 %v161_v9, %v160_v8 }
  0x5a   :  { %163 = vadd.xlane.f32.xlu0 %v162_v1 }
  0xd8   :  { %v121_v10 = vpop.xlane.xlu0 %120 }
  0xd9   :  { %v122_v11 = vadd.f32 %v121_v10, %v105_v2 }
  0xdb   :  { %124 = vst.msk [vmem:[#allocation2] sm:$0xff] %vm37_vm0, %v122_v11 }
  0xe2   :  { %v171_v15 = vld [vmem:[#allocation2] sm:$0xff] }
  0xe3   :  { %v164_v13 = vpop.xlane.xlu0 %163 }
  0xe4   :  { %v165_v14 = vadd.f32 %v164_v13, %v125_v12 }
  0xe6   :  { %167 = vst.msk [vmem:[#allocation3] sm:$0x1] %vm39_vm2, %v165_v14 }
  0xed   :  { %v219_v16 = vld [vmem:[#allocation3] ss:$0 sm:$0xff] }
  0xee   :  { %v179_v18 = vadd.f32 %v219_v16, %v171_v15 }
  0xf0   :  { %v182_v19 = vadd.f32 %v181_v17, %v179_v18 }
  0xf2   :  { %v183_v20 = vmax.f32 %v182_v19, 0.0 }
  0xf4   :  { %184 = vst.msk [vmem:[%s330_s4] sm:$0xff] %vm37_vm0, %v183_v20  ;;  %v186_v21 = vsub.f32 %v183_v20, %v185_v0 }
  0xf6   :  { %v187_v22 = vmul.f32 %v186_v21, %v186_v21 }
  0xf8   :  { %v188_v23 = vsel %vm37_vm0, %v187_v22, 0.0 }
  0xf9   :  { %v189_v24 = vrot.slane %v188_v23, 4 }
  0xfb   :  { %v190_v25 = vadd.f32 %v189_v24, %v188_v23 }
  0xfd   :  { %v191_v26 = vrot.slane %v190_v25, 2 }
  0xff   :  { %v192_v27 = vadd.f32 %v191_v26, %v190_v25 }
 0x101   :  { %v193_v28 = vrot.slane %v192_v27, 1 }
 0x103   :  { %v194_v29 = vadd.f32 %v193_v28, %v192_v27 }
 0x105   :  { %220 = vpush %v194_v29 }
 0x136   :  { %s221_s2 = spop %220 }
 0x137   :  { %s196_s8 = smul.f32 0.125, %s221_s2 }
 0x139   :  { %198 = sst [smem:[#allocation8]] %s196_s8 }
 0x13a   :  { %208 = dma.smem_to_hbm %s265_s3, 16, %s331_s5, [#allocation7]  }
 0x13b   :  { %260 = dma.done.wait [#allocation7], 16  }
 0x13c   :  { %261 = vsyncadd [#allocation7], 4294967280 }
 0x13d   :  { %214 = sfence }
 0x13e   :  { %215 = vsyncpa [#allocation6], 1 }
 0x13f   :  { %216 = vsyncpa [#allocation7], 1 }

</bundles_post_ra>
